<compile_context>
chip_gen: v7x
topology: tpu7x:2x2x1
jax: 0.10.0
libtpu: 0.0.40
codegen_flags: <defaults>
</compile_context>

<pallas_src>
import functools

import jax
import jax.numpy as jnp
from jax.experimental import pallas as pl
from jax.experimental.pallas import tpu as pltpu


def _round_up(x, m):
    return ((x + m - 1) // m) * m


def _cdiv(a, b):
    return (a + b - 1) // b


def _mlp_kernel(x_ref, w1_ref, b1_ref, w2_ref, b2_ref, w3_ref, b3_ref, o_ref):
    """One batch tile: relu(x@W1+b1) -> relu(.@W2+b2) -> .@W3+b3 -> log_softmax."""
    # x arrives in native f32 straight from HBM; bf16 cast rides the VPU slot.
    x = x_ref[...].astype(w1_ref.dtype)

    # hidden layer 1: bf16 operands, f32 accumulation on the MXU. Bias add /
    # relu stay f32 (v5e has no bf16 VALU); cast to bf16 only before next dot.
    h = jnp.dot(x, w1_ref[...], preferred_element_type=jnp.float32) + b1_ref[...]
    h = jnp.maximum(h, 0.0).astype(w2_ref.dtype)
    # TODO(synk): dropout omitted (inference semantics); training-mode dropout
    # would use pltpu.prng_seed + pltpu.stateful_bernoulli here.

    # hidden layer 2
    h = jnp.dot(h, w2_ref[...], preferred_element_type=jnp.float32) + b2_ref[...]
    h = jnp.maximum(h, 0.0).astype(w3_ref.dtype)

    # output layer + log_softmax over features. Padded logit lanes carry a
    # -1e30 bias so they vanish from the max / logsumexp reduction.
    logits = jnp.dot(h, w3_ref[...], preferred_element_type=jnp.float32) + b3_ref[...]
    m = jnp.max(logits, axis=-1, keepdims=True)
    lse = m + jnp.log(jnp.sum(jnp.exp(logits - m), axis=-1, keepdims=True))
    o_ref[...] = (logits - lse).astype(o_ref.dtype)


def prepare_params(w1, b1, w2, b2, w3, b3, param_dtype=jnp.bfloat16):
    """Transpose / pad / cast the weights once, outside the per-forward path.

    Only lane (output-feature) dims are padded to 128; the x contraction dim
    stays at its native size so x never needs feature padding. Zero padding is
    exact: padded hidden lanes stay 0 through relu and hit zero next-layer
    rows. Padded output lanes get a -1e30 bias so log_softmax is unchanged on
    real lanes.
    """
    def pad2d(a, rows, cols, fill=0.0):
        return jnp.pad(a, ((0, rows - a.shape[0]), (0, cols - a.shape[1])),
                       constant_values=fill)

    in_f, h1 = w1.shape[1], w1.shape[0]
    h2, out_f = w2.shape[0], w3.shape[0]
    h1_p, h2_p, out_p = (_round_up(d, 128) for d in (h1, h2, out_f))
    # TODO(synk): at the full spec size (25088x4096) the weights exceed VMEM;
    # that regime needs a K/N reduction grid (256-aligned K/N tiles for the
    # v6e/v7x 2x256x256 MXU, 128 on v5e) instead of fully-resident weights.

    w1t = pad2d(w1.T.astype(param_dtype), in_f, h1_p)
    w2t = pad2d(w2.T.astype(param_dtype), h1_p, h2_p)
    w3t = pad2d(w3.T.astype(param_dtype), h2_p, out_p)
    b1p = pad2d(b1.reshape(1, -1).astype(jnp.float32), 1, h1_p)
    b2p = pad2d(b2.reshape(1, -1).astype(jnp.float32), 1, h2_p)
    b3p = pad2d(b3.reshape(1, -1).astype(jnp.float32), 1, out_p, fill=-1e30)
    return (w1t, b1p, w2t, b2p, w3t, b3p), out_f


def _choose_batch_tile(n, max_tile=512):
    """Balanced, sublane-aligned batch tiles.

    n <= 16: single tile, no padding (latency-bound; wall time is launch +
    weight DMA).  Otherwise: >=2 balanced tiles so ("parallel",) can shard
    across both v7x TensorCores, capped at max_tile rows (~85% of HBM roofline
    at 512 vs ~63% at 256), multiple of 8, with minimal tail padding.
    """
    if n <= 16:
        return n
    num_tiles = max(2, _cdiv(n, max_tile))
    return min(_round_up(_cdiv(n, num_tiles), 8), _round_up(n, 8))


@functools.partial(jax.jit, static_argnames=("out_size", "kernel_out_dtype"))
def classifier_forward(x, params, out_size, kernel_out_dtype=jnp.bfloat16):
    """x: (N, C, H, W) float32. Returns (N, out_size) float32 log-probabilities.

    The kernel writes its padded log-prob slab in `kernel_out_dtype` (bf16 by
    default, halving the dominant HBM writeback); the tiny (N, out_size) real
    region is then sliced + upcast to f32 to match the PyTorch output dtype.
    """
    w1t, b1p, w2t, b2p, w3t, b3p = params
    n = x.shape[0]
    x2d = x.reshape(n, -1)                    # == x.view(x.shape[0], -1)
    in_f = x2d.shape[1]
    assert in_f == w1t.shape[0], "flattened input size mismatch with W1"
    h1_p, h2_p, out_p = w1t.shape[1], w2t.shape[1], w3t.shape[1]

    tile_n = _choose_batch_tile(n)
    n_p = _round_up(n, tile_n)
    grid = (n_p // tile_n,)

    # x stays in native f32; pad only the batch dim, and only if needed.
    x_in = x2d if n_p == n else jnp.pad(x2d, ((0, n_p - n), (0, 0)))

    # VMEM budget: double-buffered f32 x tiles + resident weights (single- or
    # double-buffered) + double-buffered output tiles + activation headroom.
    weight_bytes = sum(int(a.size) * a.dtype.itemsize
                       for a in (w1t, b1p, w2t, b2p, w3t, b3p))
    single_buffer_weights = weight_bytes > (4 << 20)   # only matters for big layers
    wbuf = 1 if single_buffer_weights else 2
    out_itemsize = jnp.dtype(kernel_out_dtype).itemsize
    vmem_need = (2 * tile_n * in_f * x_in.dtype.itemsize
                 + wbuf * weight_bytes
                 + 2 * tile_n * out_p * out_itemsize
                 + 3 * tile_n * max(h1_p, h2_p) * 4)
    vmem_limit = int(min(max(2 * vmem_need, 32 << 20), 64 << 20))  # v7x phys = 64 MiB

    def const_spec(shape):
        if single_buffer_weights:
            # Constant index_map -> never re-DMA'd; 1 buffer halves resident VMEM.
            return pl.BlockSpec(shape, lambda i: (0, 0),
                                pipeline_mode=pl.Buffered(buffer_count=1))
        return pl.BlockSpec(shape, lambda i: (0, 0))

    flops = 2 * n_p * (in_f * h1_p + h1_p * h2_p + h2_p * out_p)
    bytes_accessed = (x_in.size * x_in.dtype.itemsize
                      + weight_bytes
                      + n_p * out_p * out_itemsize)
    cost = pl.CostEstimate(flops=flops, transcendentals=n_p * out_p,
                           bytes_accessed=bytes_accessed)

    out_padded = pl.pallas_call(
        _mlp_kernel,
        out_shape=jax.ShapeDtypeStruct((n_p, out_p), kernel_out_dtype),
        grid=grid,
        in_specs=[
            # x: batch-tiled -> auto double-buffered DMA overlapping compute
            pl.BlockSpec((tile_n, in_f), lambda i: (i, 0)),
            # weights / biases: constant blocks, resident across grid steps
            const_spec((in_f, h1_p)),
            const_spec((1, h1_p)),
            const_spec((h1_p, h2_p)),
            const_spec((1, h2_p)),
            const_spec((h2_p, out_p)),
            const_spec((1, out_p)),
        ],
        # lane-dense (128-wide) output slab -> unmasked vector stores
        out_specs=pl.BlockSpec((tile_n, out_p), lambda i: (i, 0)),
        compiler_params=pltpu.CompilerParams(
            dimension_semantics=("parallel",),
            vmem_limit_bytes=vmem_limit),
        cost_estimate=cost,
    )(x_in, w1t, b1p, w2t, b2p, w3t, b3p)

    # Tiny (N, out_size) slice + f32 upcast (matches the PyTorch output dtype).
    return out_padded[:n, :out_size].astype(jnp.float32)


def _init_linear(key, in_features, out_features):
    """Deterministic init mimicking torch.nn.Linear default (uniform +/- 1/sqrt(in))."""
    kw, kb = jax.random.split(key)
    bound = 1.0 / (in_features ** 0.5)
    w = jax.random.uniform(kw, (out_features, in_features), jnp.float32, -bound, bound)
    b = jax.random.uniform(kb, (out_features,), jnp.float32, -bound, bound)
    return w, b


if __name__ == "__main__":
    # Small shapes consistent with the module: input flattened from (N, C, H, W).
    batch, channels, spatial = 2, 4, 16            # -> input_size = 4*16*16 = 1024
    input_size = channels * spatial * spatial
    hidden_layers = [128, 64]
    output_size = 5

    root = jax.random.PRNGKey(0)
    kx, k1, k2, k3 = jax.random.split(root, 4)

    x = jax.random.normal(kx, (batch, channels, spatial, spatial), jnp.float32)
    w1, b1 = _init_linear(k1, input_size, hidden_layers[0])
    w2, b2 = _init_linear(k2, hidden_layers[0], hidden_layers[1])
    w3, b3 = _init_linear(k3, hidden_layers[1], output_size)

    params, out_size = prepare_params(w1, b1, w2, b2, w3, b3)
    out = classifier_forward(x, params, out_size)
    out = jax.block_until_ready(out)

    # Pure-JAX f32 reference (inference-mode dropout = identity).
    xr = x.reshape(batch, -1)
    hr = jnp.maximum(xr @ w1.T + b1, 0.0)
    hr = jnp.maximum(hr @ w2.T + b2, 0.0)
    ref = jax.nn.log_softmax(hr @ w3.T + b3, axis=1)

    assert out.shape == (batch, output_size)
    row_sums = jnp.sum(jnp.exp(out), axis=1)
    assert bool(jnp.all(jnp.abs(row_sums - 1.0) < 1e-2))   # bf16 output-slab tolerance
    assert bool(jnp.max(jnp.abs(out - ref)) < 6e-2)        # bf16-operand tolerance

    print("KERNEL_OK")
</pallas_src>

<mosaic_0001>
module attributes {stable_mosaic.version = 11 : i64} {
  func.func @_mlp_kernel(%arg0: i32, %arg1: memref<2x1024xf32, #tpu.memory_space<vmem>>, %arg2: memref<1024x128xbf16, #tpu.memory_space<vmem>>, %arg3: memref<1x128xf32, #tpu.memory_space<vmem>>, %arg4: memref<128x128xbf16, #tpu.memory_space<vmem>>, %arg5: memref<1x128xf32, #tpu.memory_space<vmem>>, %arg6: memref<128x128xbf16, #tpu.memory_space<vmem>>, %arg7: memref<1x128xf32, #tpu.memory_space<vmem>>, %arg8: memref<2x128xbf16, #tpu.memory_space<vmem>>) attributes {dimension_semantics = [#tpu.dimension_semantics<parallel>], iteration_bounds = array<i64: 1>, scalar_prefetch = 0 : i64, scratch_operands = 0 : i64, tpu.core_type = #tpu.core_type<tc>, window_params = [{transform_indices = @transform_0, window_bounds = array<i64: 2, 1024>}, {pipeline_mode = #tpu.pipeline_mode<synchronous>, transform_indices = @transform_1, window_bounds = array<i64: 1024, 128>}, {pipeline_mode = #tpu.pipeline_mode<synchronous>, transform_indices = @transform_2, window_bounds = array<i64: 1, 128>}, {pipeline_mode = #tpu.pipeline_mode<synchronous>, transform_indices = @transform_3, window_bounds = array<i64: 128, 128>}, {pipeline_mode = #tpu.pipeline_mode<synchronous>, transform_indices = @transform_4, window_bounds = array<i64: 1, 128>}, {pipeline_mode = #tpu.pipeline_mode<synchronous>, transform_indices = @transform_5, window_bounds = array<i64: 128, 128>}, {pipeline_mode = #tpu.pipeline_mode<synchronous>, transform_indices = @transform_6, window_bounds = array<i64: 1, 128>}, {transform_indices = @transform_7, window_bounds = array<i64: 2, 128>}]} {
    %c0 = arith.constant 0 : index
    %c0_0 = arith.constant 0 : index
    %0 = vector.load %arg1[%c0, %c0_0] : memref<2x1024xf32, #tpu.memory_space<vmem>>, vector<2x1024xf32>
    %1 = arith.truncf %0 : vector<2x1024xf32> to vector<2x1024xbf16>
    %c0_1 = arith.constant 0 : index
    %c0_2 = arith.constant 0 : index
    %2 = vector.load %arg2[%c0_1, %c0_2] : memref<1024x128xbf16, #tpu.memory_space<vmem>>, vector<1024x128xbf16>
    %cst = arith.constant dense<0.000000e+00> : vector<2x128xf32>
    %3 = tpu.matmul %1, %2, %cst {dimension_numbers = #tpu.dot_dimension_numbers<[1], [0], [0], [1], [0, 0, 1, 1], [], []>} : vector<2x1024xbf16>, vector<1024x128xbf16>, vector<2x128xf32> -> vector<2x128xf32>
    %c0_3 = arith.constant 0 : index
    %c0_4 = arith.constant 0 : index
    %4 = vector.load %arg3[%c0_3, %c0_4] : memref<1x128xf32, #tpu.memory_space<vmem>>, vector<1x128xf32>
    %5 = vector.broadcast %4 : vector<1x128xf32> to vector<2x128xf32>
    %6 = arith.addf %3, %5 : vector<2x128xf32>
    %cst_5 = arith.constant 0.000000e+00 : f32
    %7 = vector.broadcast %cst_5 : f32 to vector<2x128xf32>
    %8 = arith.maximumf %6, %7 : vector<2x128xf32>
    %9 = arith.truncf %8 : vector<2x128xf32> to vector<2x128xbf16>
    %c0_6 = arith.constant 0 : index
    %c0_7 = arith.constant 0 : index
    %10 = vector.load %arg4[%c0_6, %c0_7] : memref<128x128xbf16, #tpu.memory_space<vmem>>, vector<128x128xbf16>
    %cst_8 = arith.constant dense<0.000000e+00> : vector<2x128xf32>
    %11 = tpu.matmul %9, %10, %cst_8 {dimension_numbers = #tpu.dot_dimension_numbers<[1], [0], [0], [1], [0, 0, 1, 1], [], []>} : vector<2x128xbf16>, vector<128x128xbf16>, vector<2x128xf32> -> vector<2x128xf32>
    %c0_9 = arith.constant 0 : index
    %c0_10 = arith.constant 0 : index
    %12 = vector.load %arg5[%c0_9, %c0_10] : memref<1x128xf32, #tpu.memory_space<vmem>>, vector<1x128xf32>
    %13 = vector.broadcast %12 : vector<1x128xf32> to vector<2x128xf32>
    %14 = arith.addf %11, %13 : vector<2x128xf32>
    %cst_11 = arith.constant 0.000000e+00 : f32
    %15 = vector.broadcast %cst_11 : f32 to vector<2x128xf32>
    %16 = arith.maximumf %14, %15 : vector<2x128xf32>
    %17 = arith.truncf %16 : vector<2x128xf32> to vector<2x128xbf16>
    %c0_12 = arith.constant 0 : index
    %c0_13 = arith.constant 0 : index
    %18 = vector.load %arg6[%c0_12, %c0_13] : memref<128x128xbf16, #tpu.memory_space<vmem>>, vector<128x128xbf16>
    %cst_14 = arith.constant dense<0.000000e+00> : vector<2x128xf32>
    %19 = tpu.matmul %17, %18, %cst_14 {dimension_numbers = #tpu.dot_dimension_numbers<[1], [0], [0], [1], [0, 0, 1, 1], [], []>} : vector<2x128xbf16>, vector<128x128xbf16>, vector<2x128xf32> -> vector<2x128xf32>
    %c0_15 = arith.constant 0 : index
    %c0_16 = arith.constant 0 : index
    %20 = vector.load %arg7[%c0_15, %c0_16] : memref<1x128xf32, #tpu.memory_space<vmem>>, vector<1x128xf32>
    %21 = vector.broadcast %20 : vector<1x128xf32> to vector<2x128xf32>
    %22 = arith.addf %19, %21 : vector<2x128xf32>
    %cst_17 = arith.constant dense<0xFF800000> : vector<2xf32>
    %23 = vector.multi_reduction <maximumf>, %22, %cst_17 [1] : vector<2x128xf32> to vector<2xf32>
    %24 = vector.shape_cast %23 : vector<2xf32> to vector<2x1xf32>
    %25 = vector.broadcast %24 : vector<2x1xf32> to vector<2x128xf32>
    %26 = arith.subf %22, %25 : vector<2x128xf32>
    %27 = math.exp %26 : vector<2x128xf32>
    %cst_18 = arith.constant dense<0.000000e+00> : vector<2xf32>
    %28 = vector.multi_reduction <add>, %27, %cst_18 [1] : vector<2x128xf32> to vector<2xf32>
    %29 = vector.shape_cast %28 : vector<2xf32> to vector<2x1xf32>
    %30 = math.log %29 : vector<2x1xf32>
    %31 = arith.addf %24, %30 : vector<2x1xf32>
    %32 = vector.broadcast %31 : vector<2x1xf32> to vector<2x128xf32>
    %33 = arith.subf %22, %32 : vector<2x128xf32>
    %34 = arith.truncf %33 : vector<2x128xf32> to vector<2x128xbf16>
    %c0_19 = arith.constant 0 : index
    %c0_20 = arith.constant 0 : index
    %35 = vector.load %arg8[%c0_19, %c0_20] : memref<2x128xbf16, #tpu.memory_space<vmem>>, vector<2x128xbf16>
    tpu.vector_store %arg8[%c0_19, %c0_20], %34 {strides = array<i32>} : memref<2x128xbf16, #tpu.memory_space<vmem>>, vector<2x128xbf16>,
    return
  }
  func.func @transform_0(%arg0: i32) -> (i32, i32) {
    %c0_i32 = arith.constant 0 : i32
    %c0_i32_0 = arith.constant 0 : i32
    return %arg0, %c0_i32 : i32, i32
  }
  func.func @transform_1(%arg0: i32) -> (i32, i32) {
    %c0_i32 = arith.constant 0 : i32
    %c0_i32_0 = arith.constant 0 : i32
    %c0_i32_1 = arith.constant 0 : i32
    return %c0_i32, %c0_i32_0 : i32, i32
  }
  func.func @transform_2(%arg0: i32) -> (i32, i32) {
    %c0_i32 = arith.constant 0 : i32
    %c0_i32_0 = arith.constant 0 : i32
    %c0_i32_1 = arith.constant 0 : i32
    return %c0_i32, %c0_i32_0 : i32, i32
  }
  func.func @transform_3(%arg0: i32) -> (i32, i32) {
    %c0_i32 = arith.constant 0 : i32
    %c0_i32_0 = arith.constant 0 : i32
    %c0_i32_1 = arith.constant 0 : i32
    return %c0_i32, %c0_i32_0 : i32, i32
  }
  func.func @transform_4(%arg0: i32) -> (i32, i32) {
    %c0_i32 = arith.constant 0 : i32
    %c0_i32_0 = arith.constant 0 : i32
    %c0_i32_1 = arith.constant 0 : i32
    return %c0_i32, %c0_i32_0 : i32, i32
  }
  func.func @transform_5(%arg0: i32) -> (i32, i32) {
    %c0_i32 = arith.constant 0 : i32
    %c0_i32_0 = arith.constant 0 : i32
    %c0_i32_1 = arith.constant 0 : i32
    return %c0_i32, %c0_i32_0 : i32, i32
  }
  func.func @transform_6(%arg0: i32) -> (i32, i32) {
    %c0_i32 = arith.constant 0 : i32
    %c0_i32_0 = arith.constant 0 : i32
    %c0_i32_1 = arith.constant 0 : i32
    return %c0_i32, %c0_i32_0 : i32, i32
  }
  func.func @transform_7(%arg0: i32) -> (i32, i32) {
    %c0_i32 = arith.constant 0 : i32
    %c0_i32_0 = arith.constant 0 : i32
    return %arg0, %c0_i32 : i32, i32
  }
}

</mosaic_0001>

<bundles_post_ra>
// kernel: classifier_forward.1
= control target key start
LH: loop header
LB: loop body
LE: loop exit
PB: predicated region body
PF: predicated region fallthrough
CT: control target
= control target key end

     0   :  { %12 = vsyncpa [#allocation3], 0  ;;  %s1366_s24 = smov [#allocation2]   ;;  %s1514_s0 = inlined_call_operand.vmem [shape: f32[2,1024], index: 0, kind: input, shape index: {}]   ;;  %s1515_s1 = inlined_call_operand.hbm [shape: bf16[1024,128], index: 1, kind: input, shape index: {}]   ;;  %s1516_s2 = inlined_call_operand.vmem [shape: f32[1,128], index: 2, kind: input, shape index: {}]   ;;  %s1517_s3 = inlined_call_operand.vmem [shape: bf16[128,128], index: 3, kind: input, shape index: {}]   ;;  %s1518_s4 = inlined_call_operand.vmem [shape: f32[1,128], index: 4, kind: input, shape index: {}]   ;;  %s1519_s5 = inlined_call_operand.vmem [shape: bf16[128,128], index: 5, kind: input, shape index: {}]   ;;  %s1520_s6 = inlined_call_operand.vmem [shape: f32[1,128], index: 6, kind: input, shape index: {}]   ;;  %s1521_s7 = inlined_call_operand.vmem [shape: bf16[2,128], index: 7, kind: output, shape index: {}]  }
   0x1   :  { %s20_s25 = sshll.u32 %s1366_s24, 4  ;;  %s1342_s28 = scalar_lea.hbm %s1515_s1, 8192  ;;  %s21_s25 = int_to_ptr.vmem [resolvable:$true] %s20_s25 }
   0x2   :  { %p1343_p0 = scmp.ne.s32.totalorder %s1515_s1, %s1342_s28  ;;  %p1346_p1 = scmp.lt.u32.totalorder %s1342_s28, %s1515_s1 }
   0x4   :  { %p1348_p2 = pnand %p1346_p1, %p1343_p0 }
   0x6   :  { %1351 = shalt.err (!%p1348_p2)
}
   0x7   :  { %s1352_s10 = scalar_lea.vmem %s21_s25, 8192  ;;  %p1357_p4 = scmp.lt.s32.totalorder %s21_s25, %s21_s25 }
   0x8   :  { %p1353_p3 = scmp.ne.s32.totalorder %s21_s25, %s1352_s10  ;;  %p1358_p5 = scmp.lt.s32.totalorder %s1352_s10, %s1352_s10 }
   0xa   :  { %p1359_p6 = por %p1358_p5, %p1357_p4 }
   0xc   :  { %p1360_p7 = pnand %p1359_p6, %p1353_p3 }
   0xe   :  { %1363 = shalt.err (!%p1360_p7)
}
   0xf   :  { %s1367_s11 = smov 64   ;;  %s1368_s12 = smov 4  }
  0x10   :  { %26 = dma.hbm_to_vmem [thread:$0]  %s1515_s1, 8192, %s21_s25, [#allocation3], %s1367_s11, %s1367_s11, %s1368_s12  }
  0x11   :  { %1364 = dma.done.wait [#allocation3], 8192  }
  0x12   :  { %1365 = vsyncadd [#allocation3], 4294959104  ;;  %v1256_v0 = vld [vmem:[#allocation2 + $0x40] sm:$0xff]   ;;  %v1260_v4 = vld [vmem:[#allocation2 + $0x48] sm:$0xff]   ;;  %v1369_v22 = vmov 1983009808   ;;  %v49_v24 = vlaneseq }
  0x13   :  { %v1257_v1 = vld [vmem:[#allocation2 + $0xc0] sm:$0xff]   ;;  %1104 = vmatprep.subr.bf16.mxu0 %v1256_v0  ;;  %v1261_v5 = vld [vmem:[#allocation2 + $0xc8] sm:$0xff]   ;;  %v1264_v8 = vld [vmem:[#allocation2 + $0x50] sm:$0xff]   ;;  %v47_v23 = vunpack.c.l.s4 %v1369_v22  ;;  %vm1371_vm0 = vmmov 0   ;;  %vm1000_vm1 = vcmask 1041408  }
  0x14   :  { %v1258_v2 = vld [vmem:[#allocation2] sm:$0xff]   ;;  %1126 = vmatprep.subr.bf16.mxu1 %v1257_v1  ;;  %v1262_v6 = vld [vmem:[#allocation2 + $0x8] sm:$0xff]   ;;  %v1265_v9 = vld [vmem:[#allocation2 + $0xd0] sm:$0xff]   ;;  %v50_v30 = vshrl.u32 %v49_v24, 7 }
  0x15   :  { %v1259_v3 = vld [vmem:[#allocation2 + $0x80] sm:$0xff]   ;;  %1105 = vmatpush3.bf16.msra.mxu0 %v1258_v2  ;;  %v1263_v7 = vld [vmem:[#allocation2 + $0x88] sm:$0xff]   ;;  %v1266_v10 = vld [vmem:[#allocation2 + $0x10] sm:$0xff]   ;;  %v48_v29 = vunpack.c.0.s8 %v47_v23 }
  0x16   :  { %1127 = vmatpush3.bf16.msra.mxu1 %v1259_v3  ;;  %1106 = vmatprep.subr.bf16.mxu0 %v1260_v4  ;;  %v1267_v11 = vld [vmem:[#allocation2 + $0x90] sm:$0xff]   ;;  %v1268_v12 = vld [vmem:[#allocation2 + $0x58] sm:$0xff]   ;;  %v1272_v16 = vld [vmem:[#allocation2 + $0x60] sm:$0xff]  }
  0x17   :  { %1128 = vmatprep.subr.bf16.mxu1 %v1261_v5  ;;  %v1269_v13 = vld [vmem:[#allocation2 + $0xd8] sm:$0xff]   ;;  %v1273_v17 = vld [vmem:[#allocation2 + $0xe0] sm:$0xff]   ;;  %v1276_v20 = vld [vmem:[#allocation2 + $0x68] sm:$0xff]   ;;  %v1424_v35 = vsub.s32 %v48_v29, %v50_v30 }
  0x18   :  { %v1270_v14 = vld [vmem:[#allocation2 + $0x18] sm:$0xff]   ;;  %v1274_v18 = vld [vmem:[#allocation2 + $0x20] sm:$0xff]   ;;  %v1277_v21 = vld [vmem:[#allocation2 + $0xe8] sm:$0xff]  }
  0x19   :  { %1107 = vmatpush3.bf16.msra.mxu0 %v1262_v6  ;;  %v1271_v15 = vld [vmem:[#allocation2 + $0x98] sm:$0xff]   ;;  %v1275_v19 = vld [vmem:[#allocation2 + $0xa0] sm:$0xff]   ;;  %v1278_v25 = vld [vmem:[#allocation2 + $0x28] sm:$0xff]  }
  0x1a   :  { %1129 = vmatpush3.bf16.msra.mxu1 %v1263_v7  ;;  %1108 = vmatprep.subr.bf16.mxu0 %v1264_v8  ;;  %v1279_v26 = vld [vmem:[#allocation2 + $0xa8] sm:$0xff]   ;;  %v1280_v27 = vld [vmem:[#allocation2 + $0x70] sm:$0xff]   ;;  %v1284_v33 = vld [vmem:[#allocation2 + $0x78] sm:$0xff]  }
  0x1b   :  { %1130 = vmatprep.subr.bf16.mxu1 %v1265_v9  ;;  %v1281_v28 = vld [vmem:[#allocation2 + $0xf0] sm:$0xff]   ;;  %v1285_v34 = vld [vmem:[#allocation2 + $0xf8] sm:$0xff]   ;;  %v41_v38 = vld [vmem:[%s1514_s0] sm:$0xff] }
  0x1c   :  { %v1282_v31 = vld [vmem:[#allocation2 + $0x30] sm:$0xff]   ;;  %v1286_v36 = vld [vmem:[#allocation2 + $0x38] sm:$0xff]   ;;  %v52_v39 = vrot.slane %v41_v38, %v1424_v35  ;;  %v45_v40 = vcombine.high %v41_v38, %v41_v38  ;;  %v1289_v41 = vld [vmem:[#allocation2 + $0x140] sm:$0xff]  }
  0x1d   :  { %1109 = vmatpush3.bf16.msra.mxu0 %v1266_v10  ;;  %v1283_v32 = vld [vmem:[#allocation2 + $0xb0] sm:$0xff]   ;;  %v1287_v37 = vld [vmem:[#allocation2 + $0xb8] sm:$0xff]   ;;  %v1290_v42 = vld [vmem:[#allocation2 + $0x1c0] sm:$0xff]  }
  0x1e   :  { %1131 = vmatpush3.bf16.msra.mxu1 %v1267_v11  ;;  %1110 = vmatprep.subr.bf16.mxu0 %v1268_v12  ;;  %v60_v43 = vcombine.high %v52_v39, %v52_v39  ;;  %v59_v44 = vrot.slane %v45_v40, %v1424_v35  ;;  %v87_v45 = vpack.c.bf16 %v52_v39, %v52_v39  ;;  %v1291_v46 = vld [vmem:[#allocation2 + $0x100] sm:$0xff]   ;;  %v1293_v51 = vld [vmem:[#allocation2 + $0x148] sm:$0xff]   ;;  %v1297_v56 = vld [vmem:[#allocation2 + $0x150] sm:$0xff]  }
  0x1f   :  { %1132 = vmatprep.subr.bf16.mxu1 %v1269_v13  ;;  %v1292_v49 = vld [vmem:[#allocation2 + $0x180] sm:$0xff]   ;;  %v1294_v53 = vld [vmem:[#allocation2 + $0x1c8] sm:$0xff]   ;;  %v1298_v57 = vld [vmem:[#allocation2 + $0x1d0] sm:$0xff]  }
  0x20   :  { %v88_v47 = vpack.c.bf16 %v60_v43, %v60_v43  ;;  %v61_v48 = vcombine.high %v59_v44, %v59_v44  ;;  %v89_v50 = vpack.c.bf16 %v59_v44, %v59_v44  ;;  %v1295_v54 = vld [vmem:[#allocation2 + $0x108] sm:$0xff]   ;;  %v1299_v58 = vld [vmem:[#allocation2 + $0x110] sm:$0xff]   ;;  %v1301_v60 = vld [vmem:[#allocation2 + $0x158] sm:$0xff]  }
  0x21   :  { %1111 = vmatpush3.bf16.msra.mxu0 %v1270_v14  ;;  %v1296_v55 = vld [vmem:[#allocation2 + $0x188] sm:$0xff]   ;;  %v1300_v59 = vld [vmem:[#allocation2 + $0x190] sm:$0xff]   ;;  %v1302_v61 = vld [vmem:[#allocation2 + $0x1d8] sm:$0xff]  }
  0x22   :  { %1133 = vmatpush3.bf16.msra.mxu1 %v1271_v15  ;;  %1112 = vmatprep.subr.bf16.mxu0 %v1272_v16  ;;  %v90_v52 = vpack.c.bf16 %v61_v48, %v61_v48  ;;  %v1303_v62 = vld [vmem:[#allocation2 + $0x118] sm:$0xff]   ;;  %v1305_v0 = vld [vmem:[#allocation2 + $0x160] sm:$0xff]   ;;  %v1309_v4 = vld [vmem:[#allocation2 + $0x168] sm:$0xff]  }
  0x23   :  { %1134 = vmatprep.subr.bf16.mxu1 %v1273_v17  ;;  %646 = vmatprep.mubr.bf16.mxu0 %v88_v47  ;;  %v1304_v63 = vld [vmem:[#allocation2 + $0x198] sm:$0xff]   ;;  %v1306_v1 = vld [vmem:[#allocation2 + $0x1e0] sm:$0xff]   ;;  %v1310_v5 = vld [vmem:[#allocation2 + $0x1e8] sm:$0xff]  }
  0x24   :  { %686 = vmatprep.mubr.bf16.mxu1 %v90_v52  ;;  %v1307_v2 = vld [vmem:[#allocation2 + $0x120] sm:$0xff]   ;;  %v1311_v6 = vld [vmem:[#allocation2 + $0x128] sm:$0xff]   ;;  %v1313_v8 = vld [vmem:[#allocation2 + $0x170] sm:$0xff]  }
  0x25   :  { %1113 = vmatpush3.bf16.msra.mxu0 %v1274_v18  ;;  %v1308_v3 = vld [vmem:[#allocation2 + $0x1a0] sm:$0xff]   ;;  %v1312_v7 = vld [vmem:[#allocation2 + $0x1a8] sm:$0xff]   ;;  %v1314_v9 = vld [vmem:[#allocation2 + $0x1f0] sm:$0xff]  }
  0x26   :  { %1135 = vmatpush3.bf16.msra.mxu1 %v1275_v19  ;;  %1114 = vmatprep.subr.bf16.mxu0 %v1276_v20  ;;  %v1315_v10 = vld [vmem:[#allocation2 + $0x130] sm:$0xff]   ;;  %v1317_v12 = vld [vmem:[#allocation2 + $0x178] sm:$0xff]   ;;  %v42_v15 = vld [vmem:[%s1514_s0 + $0x8] sm:$0xff] }
  0x27   :  { %1136 = vmatprep.subr.bf16.mxu1 %v1277_v21  ;;  %v1316_v11 = vld [vmem:[#allocation2 + $0x1b0] sm:$0xff]   ;;  %v1318_v13 = vld [vmem:[#allocation2 + $0x1f8] sm:$0xff]   ;;  %v69_v17 = vrot.slane %v42_v15, %v1424_v35  ;;  %v62_v18 = vcombine.high %v42_v15, %v42_v15  ;;  %v1334_v39 = vld [vmem:[%s1519_s5 + $0x20] sm:$0xff]  }
  0x28   :  { %v1319_v14 = vld [vmem:[#allocation2 + $0x138] sm:$0xff]   ;;  %v1324_v29 = vld [vmem:[%s1517_s3 + $0x10] sm:$0xff]   ;;  %v1335_v40 = vld [vmem:[%s1519_s5 + $0x28] sm:$0xff]  }
  0x29   :  { %1115 = vmatpush3.bf16.msra.mxu0 %v1278_v25  ;;  %v1320_v16 = vld [vmem:[#allocation2 + $0x1b8] sm:$0xff]   ;;  %v77_v19 = vcombine.high %v69_v17, %v69_v17  ;;  %v76_v20 = vrot.slane %v62_v18, %v1424_v35  ;;  %v91_v21 = vpack.c.bf16 %v69_v17, %v69_v17  ;;  %v1330_v35 = vld [vmem:[%s1519_s5] sm:$0xff]  }
  0x2a   :  { %1137 = vmatpush3.bf16.msra.mxu1 %v1279_v26  ;;  %1116 = vmatprep.subr.bf16.mxu0 %v1280_v27  ;;  %v1322_v26 = vld [vmem:[%s1517_s3] sm:$0xff]   ;;  %v1370_v27 = vmov 0.0   ;;  %v1325_v30 = vld [vmem:[%s1517_s3 + $0x18] sm:$0xff]  }
  0x2b   :  { %1138 = vmatprep.subr.bf16.mxu1 %v1281_v28  ;;  %v92_v22 = vpack.c.bf16 %v77_v19, %v77_v19  ;;  %v78_v23 = vcombine.high %v76_v20, %v76_v20  ;;  %v93_v24 = vpack.c.bf16 %v76_v20, %v76_v20  ;;  %v1323_v28 = vld [vmem:[%s1517_s3 + $0x8] sm:$0xff]   ;;  %v1333_v38 = vld [vmem:[%s1519_s5 + $0x18] sm:$0xff]  }
  0x2d   :  { %1117 = vmatpush3.bf16.msra.mxu0 %v1282_v31  ;;  %v94_v25 = vpack.c.bf16 %v78_v23, %v78_v23  ;;  %v1326_v31 = vld [vmem:[%s1517_s3 + $0x20] sm:$0xff]  }
  0x2e   :  { %1139 = vmatpush3.bf16.msra.mxu1 %v1283_v32  ;;  %1118 = vmatprep.subr.bf16.mxu0 %v1284_v33  ;;  %v1327_v32 = vld [vmem:[%s1517_s3 + $0x28] sm:$0xff]   ;;  %v1328_v33 = vld [vmem:[%s1517_s3 + $0x30] sm:$0xff]  }
  0x2f   :  { %1140 = vmatprep.subr.bf16.mxu1 %v1285_v34  ;;  %v1329_v34 = vld [vmem:[%s1517_s3 + $0x38] sm:$0xff]  }
  0x31   :  { %1119 = vmatpush3.bf16.msra.mxu0 %v1286_v36  ;;  %v1331_v36 = vld [vmem:[%s1519_s5 + $0x8] sm:$0xff]  }
  0x32   :  { %1141 = vmatpush3.bf16.msra.mxu1 %v1287_v37  ;;  %1148 = vmatprep.subr.bf16.mxu0 %v1289_v41  ;;  %v1332_v37 = vld [vmem:[%s1519_s5 + $0x10] sm:$0xff]  }
  0x33   :  { %1170 = vmatprep.subr.bf16.mxu1 %v1290_v42  ;;  %v1021_v42 = vld [vmem:[%s1516_s2] ss:$0 sm:$0xff] }
  0x34   :  { %647 = vmatmul.mubr.bf16.vlgmr.msra.gmra.mrb[0].mxu0 %v87_v45 }
  0x35   :  { %1149 = vmatpush3.bf16.msra.mxu0 %v1291_v46  ;;  %687 = vmatmul.mubr.bf16.vlgmr.msra.gmra.mrb[0].mxu1 %v89_v50 }
  0x36   :  { %1150 = vmatprep.subr.bf16.mxu0 %v1293_v51  ;;  %1171 = vmatpush3.bf16.msra.mxu1 %v1292_v49 }
  0x37   :  { %1172 = vmatprep.subr.bf16.mxu1 %v1294_v53  ;;  %726 = vmatprep.mubr.bf16.mxu0 %v92_v22 }
  0x38   :  { %766 = vmatprep.mubr.bf16.mxu1 %v94_v25 }
  0x39   :  { %1151 = vmatpush3.bf16.msra.mxu0 %v1295_v54 }
  0x3a   :  { %1152 = vmatprep.subr.bf16.mxu0 %v1297_v56  ;;  %1173 = vmatpush3.bf16.msra.mxu1 %v1296_v55 }
  0x3b   :  { %1174 = vmatprep.subr.bf16.mxu1 %v1298_v57 }
  0x3d   :  { %1153 = vmatpush3.bf16.msra.mxu0 %v1299_v58 }
  0x3e   :  { %1154 = vmatprep.subr.bf16.mxu0 %v1301_v60  ;;  %1175 = vmatpush3.bf16.msra.mxu1 %v1300_v59 }
  0x3f   :  { %1176 = vmatprep.subr.bf16.mxu1 %v1302_v61 }
  0x41   :  { %1155 = vmatpush3.bf16.msra.mxu0 %v1303_v62 }
  0x42   :  { %1156 = vmatprep.subr.bf16.mxu0 %v1305_v0  ;;  %1177 = vmatpush3.bf16.msra.mxu1 %v1304_v63 }
  0x43   :  { %1178 = vmatprep.subr.bf16.mxu1 %v1306_v1 }
  0x45   :  { %1157 = vmatpush3.bf16.msra.mxu0 %v1307_v2 }
  0x46   :  { %1158 = vmatprep.subr.bf16.mxu0 %v1309_v4  ;;  %1179 = vmatpush3.bf16.msra.mxu1 %v1308_v3  ;;  %v1336_v4 = vld [vmem:[%s1519_s5 + $0x30] sm:$0xff]  }
  0x47   :  { %1180 = vmatprep.subr.bf16.mxu1 %v1310_v5  ;;  %v1337_v5 = vld [vmem:[%s1519_s5 + $0x38] sm:$0xff]  }
  0x49   :  { %1159 = vmatpush3.bf16.msra.mxu0 %v1311_v6  ;;  %v1086_v6 = vld [vmem:[%s1518_s4] ss:$0 sm:$0xff] }
  0x4a   :  { %1160 = vmatprep.subr.bf16.mxu0 %v1313_v8  ;;  %1181 = vmatpush3.bf16.msra.mxu1 %v1312_v7 }
  0x4b   :  { %1182 = vmatprep.subr.bf16.mxu1 %v1314_v9 }
  0x4d   :  { %1161 = vmatpush3.bf16.msra.mxu0 %v1315_v10 }
  0x4e   :  { %1162 = vmatprep.subr.bf16.mxu0 %v1317_v12  ;;  %1183 = vmatpush3.bf16.msra.mxu1 %v1316_v11 }
  0x4f   :  { %1184 = vmatprep.subr.bf16.mxu1 %v1318_v13 }
  0x51   :  { %1163 = vmatpush3.bf16.msra.mxu0 %v1319_v14  ;;  %v1095_v14 = vld [vmem:[%s1520_s6] ss:$0 sm:$0xff] }
  0x52   :  { %1185 = vmatpush3.bf16.msra.mxu1 %v1320_v16  ;;  %1210 = vmatprep.subr.bf16.mxu0 %v1370_v27 }
  0x53   :  { %1230 = vmatprep.subr.bf16.mxu1 %v1370_v27 }
  0x54   :  { %727 = vmatmul.mubr.bf16.vlgmr.msra.gmra.mrb[4].mxu0 %v91_v21 }
  0x55   :  { %767 = vmatmul.mubr.bf16.vlgmr.msra.gmra.mrb[4].mxu1 %v93_v24  ;;  %1211 = vmatpush3.bf16.msra.mxu0 %v1322_v26 }
  0x56   :  { %1212 = vmatprep.subr.bf16.mxu0 %v1370_v27  ;;  %1226 = vmatprep.mubr.msk.bf16.mxu0 %vm1371_vm0, %v1370_v27 }
  0x57   :  { %1246 = vmatprep.mubr.msk.bf16.mxu1 %vm1371_vm0, %v1370_v27  ;;  %1231 = vmatpush3.bf16.msra.mxu1 %v1330_v35 }
  0x58   :  { %1232 = vmatprep.subr.bf16.mxu1 %v1370_v27 }
  0x59   :  { %1213 = vmatpush3.bf16.msra.mxu0 %v1323_v28 }
  0x5a   :  { %1214 = vmatprep.subr.bf16.mxu0 %v1370_v27 }
  0x5b   :  { %1233 = vmatpush3.bf16.msra.mxu1 %v1331_v36 }
  0x5c   :  { %1234 = vmatprep.subr.bf16.mxu1 %v1370_v27 }
  0x5d   :  { %1215 = vmatpush3.bf16.msra.mxu0 %v1324_v29 }
  0x5e   :  { %1216 = vmatprep.subr.bf16.mxu0 %v1370_v27 }
  0x5f   :  { %1235 = vmatpush3.bf16.msra.mxu1 %v1332_v37 }
  0x60   :  { %1236 = vmatprep.subr.bf16.mxu1 %v1370_v27 }
  0x61   :  { %1217 = vmatpush3.bf16.msra.mxu0 %v1325_v30 }
  0x62   :  { %1218 = vmatprep.subr.bf16.mxu0 %v1370_v27 }
  0x63   :  { %1237 = vmatpush3.bf16.msra.mxu1 %v1333_v38 }
  0x64   :  { %1238 = vmatprep.subr.bf16.mxu1 %v1370_v27 }
  0x65   :  { %1219 = vmatpush3.bf16.msra.mxu0 %v1326_v31 }
  0x66   :  { %1220 = vmatprep.subr.bf16.mxu0 %v1370_v27 }
  0x67   :  { %1239 = vmatpush3.bf16.msra.mxu1 %v1334_v39 }
  0x68   :  { %1240 = vmatprep.subr.bf16.mxu1 %v1370_v27 }
  0x69   :  { %1221 = vmatpush3.bf16.msra.mxu0 %v1327_v32 }
  0x6a   :  { %1222 = vmatprep.subr.bf16.mxu0 %v1370_v27 }
  0x6b   :  { %1241 = vmatpush3.bf16.msra.mxu1 %v1335_v40 }
  0x6c   :  { %1242 = vmatprep.subr.bf16.mxu1 %v1370_v27 }
  0x6d   :  { %1223 = vmatpush3.bf16.msra.mxu0 %v1328_v33 }
  0x6e   :  { %1224 = vmatprep.subr.bf16.mxu0 %v1370_v27 }
  0x6f   :  { %1243 = vmatpush3.bf16.msra.mxu1 %v1336_v4 }
  0x70   :  { %1244 = vmatprep.subr.bf16.mxu1 %v1370_v27 }
  0x71   :  { %1225 = vmatpush3.bf16.msra.mxu0 %v1329_v34 }
  0x73   :  { %1245 = vmatpush3.bf16.msra.mxu1 %v1337_v5 }
 0x107   :  { %v1120_v41 = vpop.f32.mrb[0].mxu0 }
 0x108   :  { %v1121_v43 = vpop.f32.mrb[1].mxu0  ;;  %v1142_v44 = vpop.f32.mrb[0].mxu1 }
 0x109   :  { %v1122_v45 = vadd.f32 %v1121_v43, %v1120_v41  ;;  %v1123_v46 = vpop.f32.mrb[2].mxu0  ;;  %v1143_v47 = vpop.f32.mrb[1].mxu1 }
 0x10a   :  { %v1124_v48 = vpop.f32.mrb[3].mxu0  ;;  %v1144_v50 = vadd.f32 %v1143_v47, %v1142_v44  ;;  %v1145_v51 = vpop.f32.mrb[2].mxu1 }
 0x10b   :  { %v649_v49 = vadd.f32 %v1122_v45, %v1021_v42  ;;  %v1146_v52 = vpop.f32.mrb[3].mxu1 }
 0x10d   :  { %v689_v53 = vadd.f32 %v1144_v50, %v649_v49 }
 0x127   :  { %v1164_v54 = vpop.f32.mrb[4].mxu0 }
 0x128   :  { %v1165_v55 = vpop.f32.mrb[5].mxu0  ;;  %v1186_v56 = vpop.f32.mrb[4].mxu1 }
 0x129   :  { %v1166_v57 = vadd.f32 %v1165_v55, %v1164_v54  ;;  %v1167_v58 = vpop.f32.mrb[6].mxu0  ;;  %v1187_v59 = vpop.f32.mrb[5].mxu1 }
 0x12a   :  { %v1168_v60 = vpop.f32.mrb[7].mxu0  ;;  %v1188_v62 = vadd.f32 %v1187_v59, %v1186_v56  ;;  %v1189_v63 = vpop.f32.mrb[6].mxu1 }
 0x12b   :  { %v729_v61 = vadd.f32 %v1166_v57, %v689_v53  ;;  %v1190_v0 = vpop.f32.mrb[7].mxu1 }
 0x12d   :  { %v769_v1 = vadd.f32 %v1188_v62, %v729_v61 }
 0x12f   :  { %v774_v2 = vmax.f32 %v769_v1, 0.0 }
 0x131   :  { %v775_v3 = vpack.c.bf16 %v774_v2, %v774_v2 }
 0x133   :  { %1227 = vmatmul.mubr.bf16.vlgmr.msra.gmra.mrb[8].mxu0 %v775_v3 }
 0x206   :  { %v881_v7 = vpop.f32.mrb[8].mxu0 }
 0x207   :  { %v882_v8 = vadd.f32 %v1086_v6, %v881_v7  ;;  %v1228_v9 = vpop.f32.mrb[9].mxu0 }
 0x208   :  { %v884_v10 = vpop.f32.mrb[10].mxu0 }
 0x209   :  { %v887_v11 = vmax.f32 %v882_v8, 0.0  ;;  %v1229_v12 = vpop.f32.mrb[11].mxu0 }
 0x20b   :  { %v888_v13 = vpack.c.bf16 %v887_v11, %v887_v11 }
 0x20d   :  { %1247 = vmatmul.mubr.bf16.vlgmr.msra.gmra.mrb[8].mxu1 %v888_v13 }
 0x2e0   :  { %v994_v15 = vpop.f32.mrb[8].mxu1 }
 0x2e1   :  { %v995_v16 = vadd.f32 %v1095_v14, %v994_v15  ;;  %v1248_v17 = vpop.f32.mrb[9].mxu1 }
 0x2e2   :  { %v997_v18 = vpop.f32.mrb[10].mxu1 }
 0x2e3   :  { %v1249_v19 = vpop.f32.mrb[11].mxu1  ;;  %v1001_v20 = vsel %vm1000_vm1, %v995_v16, -inf }
 0x2e4   :  { %1002 = vmax.xlane.f32.xlu0 %v1001_v20 }
 0x371   :  { %v1003_v21 = vpop.xlane.xlu0 %1002 }
 0x372   :  { %v1004_v22 = vsub.f32 %v995_v16, %v1003_v21 }
 0x374   :  { %v1005_v23 = vmul.f32 1.442695, %v1004_v22 }
 0x376   :  { %1338 = vpow2.f32 %v1005_v23 }
 0x380   :  { %v1339_v24 = vpop.eup %1338 }
 0x381   :  { %v1007_v25 = vsel %vm1000_vm1, %v1339_v24, 0.0 }
 0x382   :  { %1008 = vadd.xlane.f32.xlu0 %v1007_v25 }
 0x40f   :  { %v1009_v26 = vpop.xlane.xlu0 %1008 }
 0x410   :  { %1340 = vlog2.f32 %v1009_v26 }
 0x41a   :  { %v1341_v27 = vpop.eup %1340 }
 0x41b   :  { %v1011_v28 = vmul.f32 0.6931472, %v1341_v27 }
 0x41d   :  { %v1012_v29 = vadd.f32 %v1011_v28, %v1003_v21 }
 0x41f   :  { %v1013_v30 = vsub.f32 %v995_v16, %v1012_v29 }
 0x421   :  { %v1014_v31 = vpack.c.bf16 %v1013_v30, %v1013_v30 }
 0x423   :  { %1015 = vst [vmem:[%s1521_s7] sm:$0x1] %v1014_v31 }
 0x424   :  { %1020 = vsyncpa [#allocation3], 1 }

</bundles_post_ra>
